<compile_context>
chip_gen: v6e
topology: v6e:2x2x1
jax: 0.10.0
libtpu: 0.0.40
codegen_flags: <defaults>
</compile_context>

<pallas_src>
import functools

import jax
import jax.numpy as jnp
from jax.experimental import pallas as pl
from jax.experimental.pallas import tpu as pltpu

NUM_SAMPLES = 5
DROPOUT_PS = tuple((i + 1) * 0.1 for i in range(NUM_SAMPLES))
# uint32 thresholds: keep  <=>  bits >= p * 2^32   (so P(keep) = 1 - p)
_THRESHOLDS = tuple(int(round(p * 2.0**32)) for p in DROPOUT_PS)


def multisampled_dropout_kernel(x_ref, bits_ref, w_ref, b_ref, o_ref):
    x = x_ref[...]                                   # (TB, H) native dtype

    # Combined dropout keep-scale across the 5 samples, accumulated in f32 on
    # the VPU (f32 elementwise is the fast path on v5e too).
    scale = jnp.zeros(x.shape, jnp.float32)
    for i, p in enumerate(DROPOUT_PS):
        bits = bits_ref[i]                           # (TB, H) uint32
        keep = (bits >= jnp.uint32(_THRESHOLDS[i])).astype(jnp.float32)
        scale = scale + keep * jnp.float32(1.0 / (1.0 - p))
    scale = scale * jnp.float32(1.0 / NUM_SAMPLES)   # fold the mean in

    # Scale x in f32, cast ONCE back to the matmul dtype (bf16 fast path when
    # x / W are bf16), then a single MXU matmul with f32 accumulation.
    x_scaled = (x.astype(jnp.float32) * scale).astype(w_ref.dtype)
    acc = jnp.dot(x_scaled, w_ref[...], preferred_element_type=jnp.float32)

    # Bias is common to all samples -> added once in the epilogue.
    o_ref[...] = (acc + b_ref[...].astype(jnp.float32)).astype(o_ref.dtype)


def _tile_b(batch):
    # Largest batch tile that divides B (saturates MXU M-dim, amortizes the
    # per-grid-step overhead); falls back to a single full-size tile.
    for t in (512, 256, 128, 64, 32, 16, 8):
        if batch % t == 0:
            return t
    return batch


@functools.partial(jax.jit, static_argnames=())
def multisampled_dropout(x, w, b, key):
    B, H = x.shape
    H2, C = w.shape
    assert H == H2 and b.shape == (1, C)

    # Independent random bits for every (sample, element): no per-tile seed
    # plumbing needed and no correlated masks across batch tiles.
    bits = jax.random.bits(key, (NUM_SAMPLES, B, H), dtype=jnp.uint32)

    tb = _tile_b(B)
    grid = (B // tb,)
    return pl.pallas_call(
        multisampled_dropout_kernel,
        out_shape=jax.ShapeDtypeStruct((B, C), jnp.float32),
        grid=grid,
        in_specs=[
            pl.BlockSpec((tb, H), lambda i: (i, 0)),                  # x tile
            pl.BlockSpec((NUM_SAMPLES, tb, H), lambda i: (0, i, 0)),  # bits
            pl.BlockSpec((H, C), lambda i: (0, 0)),                   # W resident
            pl.BlockSpec((1, C), lambda i: (0, 0)),                   # bias
        ],
        out_specs=pl.BlockSpec((tb, C), lambda i: (i, 0)),
        compiler_params=pltpu.CompilerParams(
            # Batch tiles are independent -> shard across TCs on v7x megacore.
            dimension_semantics=("parallel",),
            # Fits all generations (v7x physical VMEM = 64 MiB).
            vmem_limit_bytes=64 * 1024 * 1024,
        ),
    )(x, bits, w, b)


if __name__ == "__main__":
    # Small deterministic example: batch=8, hidden=128, num_classes=128
    # (lane-dense output: C is a multiple of 128).
    B, H, C = 8, 128, 128
    key = jax.random.PRNGKey(0)
    kx, kw, kb, kd = jax.random.split(key, 4)

    x = jax.random.normal(kx, (B, H), dtype=jnp.float32)
    # PyTorch Linear weight is (C, H); stored transposed as (H, C) so the
    # kernel computes x @ W.
    w = jax.random.normal(kw, (H, C), dtype=jnp.float32) * (1.0 / jnp.sqrt(H))
    b = jax.random.normal(kb, (1, C), dtype=jnp.float32) * 0.01

    out = jax.block_until_ready(multisampled_dropout(x, w, b, kd))
    assert out.shape == (B, C)
    assert bool(jnp.all(jnp.isfinite(out)))

    # Pure-JAX reference using the same random bits / keep decisions
    # (naive 5-matmul form; kernel differs only by f32 summation order).
    bits = jax.random.bits(kd, (NUM_SAMPLES, B, H), dtype=jnp.uint32)
    ys = []
    for i, p in enumerate(DROPOUT_PS):
        keep = (bits[i] >= jnp.uint32(_THRESHOLDS[i])).astype(jnp.float32)
        xd = x * keep * jnp.float32(1.0 / (1.0 - p))
        ys.append(jnp.dot(xd, w, preferred_element_type=jnp.float32) + b)
    ref = jnp.mean(jnp.stack(ys, axis=0), axis=0)
    assert bool(jnp.allclose(out, ref, rtol=2e-2, atol=2e-2)), float(
        jnp.max(jnp.abs(out - ref)))

    print("KERNEL_OK")
</pallas_src>

<mosaic_0001>
module attributes {stable_mosaic.version = 11 : i64} {
  func.func @multisampled_dropout_kernel(%arg0: i32, %arg1: memref<8x128xf32, #tpu.memory_space<vmem>>, %arg2: memref<5x8x128xi32, #tpu.memory_space<vmem>>, %arg3: memref<128x128xf32, #tpu.memory_space<vmem>>, %arg4: memref<1x128xf32, #tpu.memory_space<vmem>>, %arg5: memref<8x128xf32, #tpu.memory_space<vmem>>) attributes {dimension_semantics = [#tpu.dimension_semantics<parallel>], iteration_bounds = array<i64: 1>, scalar_prefetch = 0 : i64, scratch_operands = 0 : i64, tpu.core_type = #tpu.core_type<tc>, window_params = [{transform_indices = @transform_0, window_bounds = array<i64: 8, 128>}, {transform_indices = @transform_1, window_bounds = array<i64: 5, 8, 128>}, {pipeline_mode = #tpu.pipeline_mode<synchronous>, transform_indices = @transform_2, window_bounds = array<i64: 128, 128>}, {pipeline_mode = #tpu.pipeline_mode<synchronous>, transform_indices = @transform_3, window_bounds = array<i64: 1, 128>}, {transform_indices = @transform_4, window_bounds = array<i64: 8, 128>}]} {
    %c0 = arith.constant 0 : index
    %c0_0 = arith.constant 0 : index
    %0 = vector.load %arg1[%c0, %c0_0] : memref<8x128xf32, #tpu.memory_space<vmem>>, vector<8x128xf32>
    %cst = arith.constant 0.000000e+00 : f32
    %1 = vector.broadcast %cst : f32 to vector<8x128xf32>
    %c0_1 = arith.constant 0 : index
    %c0_2 = arith.constant 0 : index
    %c0_3 = arith.constant 0 : index
    %2 = vector.load %arg2[%c0_1, %c0_2, %c0_3] : memref<5x8x128xi32, #tpu.memory_space<vmem>>, vector<1x8x128xi32>
    %3 = vector.shape_cast %2 : vector<1x8x128xi32> to vector<8x128xi32>
    %c429496730_i32 = arith.constant 429496730 : i32
    %4 = vector.broadcast %c429496730_i32 : i32 to vector<8x128xi32>
    %5 = arith.cmpi uge, %3, %4 : vector<8x128xi32>
    %6 = arith.extui %5 : vector<8x128xi1> to vector<8x128xi32>
    %7 = arith.sitofp %6 : vector<8x128xi32> to vector<8x128xf32>
    %cst_4 = arith.constant 1.11111116 : f32
    %8 = vector.broadcast %cst_4 : f32 to vector<8x128xf32>
    %9 = arith.mulf %7, %8 : vector<8x128xf32>
    %10 = arith.addf %1, %9 : vector<8x128xf32>
    %c1 = arith.constant 1 : index
    %c0_5 = arith.constant 0 : index
    %c0_6 = arith.constant 0 : index
    %11 = vector.load %arg2[%c1, %c0_5, %c0_6] : memref<5x8x128xi32, #tpu.memory_space<vmem>>, vector<1x8x128xi32>
    %12 = vector.shape_cast %11 : vector<1x8x128xi32> to vector<8x128xi32>
    %c858993459_i32 = arith.constant 858993459 : i32
    %13 = vector.broadcast %c858993459_i32 : i32 to vector<8x128xi32>
    %14 = arith.cmpi uge, %12, %13 : vector<8x128xi32>
    %15 = arith.extui %14 : vector<8x128xi1> to vector<8x128xi32>
    %16 = arith.sitofp %15 : vector<8x128xi32> to vector<8x128xf32>
    %cst_7 = arith.constant 1.250000e+00 : f32
    %17 = vector.broadcast %cst_7 : f32 to vector<8x128xf32>
    %18 = arith.mulf %16, %17 : vector<8x128xf32>
    %19 = arith.addf %10, %18 : vector<8x128xf32>
    %c2 = arith.constant 2 : index
    %c0_8 = arith.constant 0 : index
    %c0_9 = arith.constant 0 : index
    %20 = vector.load %arg2[%c2, %c0_8, %c0_9] : memref<5x8x128xi32, #tpu.memory_space<vmem>>, vector<1x8x128xi32>
    %21 = vector.shape_cast %20 : vector<1x8x128xi32> to vector<8x128xi32>
    %c1288490189_i32 = arith.constant 1288490189 : i32
    %22 = vector.broadcast %c1288490189_i32 : i32 to vector<8x128xi32>
    %23 = arith.cmpi uge, %21, %22 : vector<8x128xi32>
    %24 = arith.extui %23 : vector<8x128xi1> to vector<8x128xi32>
    %25 = arith.sitofp %24 : vector<8x128xi32> to vector<8x128xf32>
    %cst_10 = arith.constant 1.42857146 : f32
    %26 = vector.broadcast %cst_10 : f32 to vector<8x128xf32>
    %27 = arith.mulf %25, %26 : vector<8x128xf32>
    %28 = arith.addf %19, %27 : vector<8x128xf32>
    %c3 = arith.constant 3 : index
    %c0_11 = arith.constant 0 : index
    %c0_12 = arith.constant 0 : index
    %29 = vector.load %arg2[%c3, %c0_11, %c0_12] : memref<5x8x128xi32, #tpu.memory_space<vmem>>, vector<1x8x128xi32>
    %30 = vector.shape_cast %29 : vector<1x8x128xi32> to vector<8x128xi32>
    %c1717986918_i32 = arith.constant 1717986918 : i32
    %31 = vector.broadcast %c1717986918_i32 : i32 to vector<8x128xi32>
    %32 = arith.cmpi uge, %30, %31 : vector<8x128xi32>
    %33 = arith.extui %32 : vector<8x128xi1> to vector<8x128xi32>
    %34 = arith.sitofp %33 : vector<8x128xi32> to vector<8x128xf32>
    %cst_13 = arith.constant 1.66666663 : f32
    %35 = vector.broadcast %cst_13 : f32 to vector<8x128xf32>
    %36 = arith.mulf %34, %35 : vector<8x128xf32>
    %37 = arith.addf %28, %36 : vector<8x128xf32>
    %c4 = arith.constant 4 : index
    %c0_14 = arith.constant 0 : index
    %c0_15 = arith.constant 0 : index
    %38 = vector.load %arg2[%c4, %c0_14, %c0_15] : memref<5x8x128xi32, #tpu.memory_space<vmem>>, vector<1x8x128xi32>
    %39 = vector.shape_cast %38 : vector<1x8x128xi32> to vector<8x128xi32>
    %c-2147483648_i32 = arith.constant -2147483648 : i32
    %40 = vector.broadcast %c-2147483648_i32 : i32 to vector<8x128xi32>
    %41 = arith.cmpi uge, %39, %40 : vector<8x128xi32>
    %42 = arith.extui %41 : vector<8x128xi1> to vector<8x128xi32>
    %43 = arith.sitofp %42 : vector<8x128xi32> to vector<8x128xf32>
    %cst_16 = arith.constant 2.000000e+00 : f32
    %44 = vector.broadcast %cst_16 : f32 to vector<8x128xf32>
    %45 = arith.mulf %43, %44 : vector<8x128xf32>
    %46 = arith.addf %37, %45 : vector<8x128xf32>
    %cst_17 = arith.constant 2.000000e-01 : f32
    %47 = vector.broadcast %cst_17 : f32 to vector<8x128xf32>
    %48 = arith.mulf %46, %47 : vector<8x128xf32>
    %49 = arith.mulf %0, %48 : vector<8x128xf32>
    %c0_18 = arith.constant 0 : index
    %c0_19 = arith.constant 0 : index
    %50 = vector.load %arg3[%c0_18, %c0_19] : memref<128x128xf32, #tpu.memory_space<vmem>>, vector<128x128xf32>
    %cst_20 = arith.constant dense<0.000000e+00> : vector<8x128xf32>
    %51 = tpu.matmul %49, %50, %cst_20 {dimension_numbers = #tpu.dot_dimension_numbers<[1], [0], [0], [1], [0, 0, 1, 1], [], []>} : vector<8x128xf32>, vector<128x128xf32>, vector<8x128xf32> -> vector<8x128xf32>
    %c0_21 = arith.constant 0 : index
    %c0_22 = arith.constant 0 : index
    %52 = vector.load %arg4[%c0_21, %c0_22] : memref<1x128xf32, #tpu.memory_space<vmem>>, vector<1x128xf32>
    %53 = vector.broadcast %52 : vector<1x128xf32> to vector<8x128xf32>
    %54 = arith.addf %51, %53 : vector<8x128xf32>
    %c0_23 = arith.constant 0 : index
    %c0_24 = arith.constant 0 : index
    %55 = vector.load %arg5[%c0_23, %c0_24] : memref<8x128xf32, #tpu.memory_space<vmem>>, vector<8x128xf32>
    tpu.vector_store %arg5[%c0_23, %c0_24], %54 {strides = array<i32>} : memref<8x128xf32, #tpu.memory_space<vmem>>, vector<8x128xf32>,
    return
  }
  func.func @transform_0(%arg0: i32) -> (i32, i32) {
    %c0_i32 = arith.constant 0 : i32
    %c0_i32_0 = arith.constant 0 : i32
    return %arg0, %c0_i32 : i32, i32
  }
  func.func @transform_1(%arg0: i32) -> (i32, i32, i32) {
    %c0_i32 = arith.constant 0 : i32
    %c0_i32_0 = arith.constant 0 : i32
    %c0_i32_1 = arith.constant 0 : i32
    return %c0_i32, %arg0, %c0_i32_0 : i32, i32, i32
  }
  func.func @transform_2(%arg0: i32) -> (i32, i32) {
    %c0_i32 = arith.constant 0 : i32
    %c0_i32_0 = arith.constant 0 : i32
    %c0_i32_1 = arith.constant 0 : i32
    return %c0_i32, %c0_i32_0 : i32, i32
  }
  func.func @transform_3(%arg0: i32) -> (i32, i32) {
    %c0_i32 = arith.constant 0 : i32
    %c0_i32_0 = arith.constant 0 : i32
    %c0_i32_1 = arith.constant 0 : i32
    return %c0_i32, %c0_i32_0 : i32, i32
  }
  func.func @transform_4(%arg0: i32) -> (i32, i32) {
    %c0_i32 = arith.constant 0 : i32
    %c0_i32_0 = arith.constant 0 : i32
    return %arg0, %c0_i32 : i32, i32
  }
}

</mosaic_0001>

<bundles_post_ra>
// kernel: multisampled_dropout.1
= control target key start
LH: loop header
LB: loop body
LE: loop exit
PB: predicated region body
PF: predicated region fallthrough
CT: control target
= control target key end

     0   :  { %9 = vsyncpa [#allocation3], 0  ;;  %s370_s0 = inlined_call_operand.vmem [shape: f32[8,128], index: 0, kind: input, shape index: {}]   ;;  %s371_s1 = inlined_call_operand.vmem [shape: u32[5,8,128], index: 1, kind: input, shape index: {}]   ;;  %s372_s2 = inlined_call_operand.hbm [shape: f32[128,128], index: 2, kind: input, shape index: {}]   ;;  %s373_s3 = inlined_call_operand.vmem [shape: f32[1,128], index: 3, kind: input, shape index: {}]   ;;  %s374_s4 = inlined_call_operand.hbm [shape: f32[8,128], index: 4, kind: output, shape index: {}]  }
   0x1   :  { %10 = vsyncpa [#allocation4], 0  ;;  %s290_s15 = smov [#allocation2]  }
   0x2   :  { %s20_s16 = sshll.u32 %s290_s15, 4  ;;  %s21_s16 = int_to_ptr.vmem [resolvable:$true] %s20_s16 }
   0x3   :  { %s254_s17 = scalar_lea.vmem %s21_s16, 2048  ;;  %p259_p1 = scmp.lt.s32.totalorder %s21_s16, %s21_s16 }
   0x4   :  { %p255_p0 = scmp.ne.s32.totalorder %s21_s16, %s254_s17  ;;  %p260_p2 = scmp.lt.s32.totalorder %s254_s17, %s254_s17 }
   0x6   :  { %p261_p3 = por %p260_p2, %p259_p1 }
   0x8   :  { %p262_p4 = pnand %p261_p3, %p255_p0 }
   0xa   :  { %265 = shalt.err (!%p262_p4)
}
   0xb   :  { %s291_s18 = smov 128   ;;  %s292_s19 = smov 8  }
   0xc   :  { %26 = dma.hbm_to_vmem [thread:$0]  %s372_s2, 2048, %s21_s16, [#allocation3], %s291_s18, %s291_s18, %s292_s19  }
   0xd   :  { %286 = dma.done.wait [#allocation3], 2048  }
   0xe   :  { %287 = vsyncadd [#allocation3], 4294965248  ;;  %v293_v0 = vmov 0.0   ;;  %vm294_vm0 = vmmov 0   ;;  %v84_v1 = vld [vmem:[#allocation2 + $0x78] sm:$0xff]  ;;  %v83_v2 = vld [vmem:[#allocation2 + $0x70] sm:$0xff] }
   0xf   :  { %205 = vmatprep.subr.mxu0 %v293_v0  ;;  %237 = vmatprep.mubr.msk.f32.mxu0 %vm294_vm0, %v293_v0  ;;  %v82_v3 = vld [vmem:[#allocation2 + $0x68] sm:$0xff]  ;;  %v81_v4 = vld [vmem:[#allocation2 + $0x60] sm:$0xff]  ;;  %v80_v5 = vld [vmem:[#allocation2 + $0x58] sm:$0xff]  ;;  %s295_s8 = smov [#allocation5]  }
  0x10   :  { %206 = vmatpush3.msra.mxu0 %v84_v1  ;;  %v33_v6 = vld [vmem:[%s371_s1] sm:$0xff]  ;;  %v79_v7 = vld [vmem:[#allocation2 + $0x50] sm:$0xff]  ;;  %v179_v8 = vld [vmem:[%s371_s1 + $0x8] sm:$0xff]  ;;  %s169_s9 = sshll.u32 %s295_s8, 4  ;;  %s170_s9 = int_to_ptr.vmem [resolvable:$true] %s169_s9 }
  0x11   :  { %207 = vmatprep.subr.mxu0 %v293_v0  ;;  %vm34_vm1 = vcmp.ge.u32.totalorder %v33_v6, 429496730  ;;  %v181_v9 = vld [vmem:[%s371_s1 + $0x10] sm:$0xff]  ;;  %v183_v10 = vld [vmem:[%s371_s1 + $0x18] sm:$0xff]  ;;  %vm41_vm2 = vcmp.ge.u32.totalorder %v179_v8, 858993459  ;;  %p271_p6 = scmp.lt.s32.totalorder %s170_s9, %s170_s9 }
  0x12   :  { %208 = vmatpush3.msra.mxu0 %v83_v2  ;;  %v178_v11 = vsel %vm34_vm1, 1.0, %v293_v0  ;;  %vm48_vm3 = vcmp.ge.u32.totalorder %v181_v9, 1288490189  ;;  %v185_v12 = vld [vmem:[%s371_s1 + $0x20] sm:$0xff]  ;;  %v180_v14 = vsel %vm41_vm2, 1.0, %v293_v0  ;;  %v78_v19 = vld [vmem:[#allocation2 + $0x48] sm:$0xff] }
  0x13   :  { %209 = vmatprep.subr.mxu0 %v293_v0  ;;  %v37_v13 = vmul.f32 1.1111112, %v178_v11  ;;  %v182_v15 = vsel %vm48_vm3, 1.0, %v293_v0  ;;  %vm55_vm4 = vcmp.ge.u32.totalorder %v183_v10, 1717986918  ;;  %v44_v16 = vmul.f32 1.25, %v180_v14 }
  0x14   :  { %210 = vmatpush3.msra.mxu0 %v82_v3  ;;  %v51_v17 = vmul.f32 1.4285715, %v182_v15  ;;  %v184_v18 = vsel %vm55_vm4, 1.0, %v293_v0  ;;  %vm62_vm5 = vcmp.ge.u32.totalorder %v185_v12, 2147483648  ;;  %v77_v21 = vld [vmem:[#allocation2 + $0x40] sm:$0xff]  ;;  %v76_v25 = vld [vmem:[#allocation2 + $0x38] sm:$0xff] }
  0x15   :  { %211 = vmatprep.subr.mxu0 %v293_v0  ;;  %v45_v20 = vadd.f32 %v44_v16, %v37_v13  ;;  %v58_v22 = vmul.f32 1.6666666, %v184_v18  ;;  %v186_v24 = vsel %vm62_vm5, 1.0, %v293_v0  ;;  %v75_v26 = vld [vmem:[#allocation2 + $0x30] sm:$0xff]  ;;  %v74_v29 = vld [vmem:[#allocation2 + $0x28] sm:$0xff]  ;;  %v73_v30 = vld [vmem:[#allocation2 + $0x20] sm:$0xff] }
  0x16   :  { %212 = vmatpush3.msra.mxu0 %v81_v4  ;;  %v65_v28 = vmul.f32 2.0, %v186_v24  ;;  %v72_v32 = vld [vmem:[#allocation2 + $0x18] sm:$0xff]  ;;  %v71_v33 = vld [vmem:[#allocation2 + $0x10] sm:$0xff]  ;;  %v32_v35 = vld [vmem:[%s370_s0] sm:$0xff]  ;;  %s266_s0 = scalar_lea.vmem %s170_s9, 128 }
  0x17   :  { %213 = vmatprep.subr.mxu0 %v293_v0  ;;  %v52_v23 = vadd.f32 %v51_v17, %v45_v20  ;;  %v70_v36 = vld [vmem:[#allocation2 + $0x8] sm:$0xff]  ;;  %v69_v37 = vld [vmem:[#allocation2] sm:$0xff]  ;;  %p267_p5 = scmp.ne.s32.totalorder %s170_s9, %s266_s0  ;;  %p272_p7 = scmp.lt.s32.totalorder %s266_s0, %s266_s0 }
  0x18   :  { %214 = vmatpush3.msra.mxu0 %v80_v5  ;;  %v187_v39 = vld [vmem:[%s373_s3] ss:$0 sm:$0xff] }
  0x19   :  { %215 = vmatprep.subr.mxu0 %v293_v0  ;;  %v59_v27 = vadd.f32 %v58_v22, %v52_v23  ;;  %p273_p8 = por %p272_p7, %p271_p6 }
  0x1a   :  { %216 = vmatpush3.msra.mxu0 %v79_v7 }
  0x1b   :  { %217 = vmatprep.subr.mxu0 %v293_v0  ;;  %v66_v31 = vadd.f32 %v65_v28, %v59_v27  ;;  %p274_p9 = pnand %p273_p8, %p267_p5 }
  0x1c   :  { %218 = vmatpush3.msra.mxu0 %v78_v19 }
  0x1d   :  { %219 = vmatprep.subr.mxu0 %v293_v0  ;;  %v67_v34 = vmul.f32 0.2, %v66_v31 }
  0x1e   :  { %220 = vmatpush3.msra.mxu0 %v77_v21 }
  0x1f   :  { %221 = vmatprep.subr.mxu0 %v293_v0  ;;  %v68_v38 = vmul.f32 %v67_v34, %v32_v35 }
  0x20   :  { %222 = vmatpush3.msra.mxu0 %v76_v25 }
  0x21   :  { %223 = vmatprep.subr.mxu0 %v293_v0 }
  0x22   :  { %224 = vmatpush3.msra.mxu0 %v75_v26 }
  0x23   :  { %225 = vmatprep.subr.mxu0 %v293_v0 }
  0x24   :  { %226 = vmatpush3.msra.mxu0 %v74_v29 }
  0x25   :  { %227 = vmatprep.subr.mxu0 %v293_v0 }
  0x26   :  { %228 = vmatpush3.msra.mxu0 %v73_v30 }
  0x27   :  { %229 = vmatprep.subr.mxu0 %v293_v0 }
  0x28   :  { %230 = vmatpush3.msra.mxu0 %v72_v32 }
  0x29   :  { %231 = vmatprep.subr.mxu0 %v293_v0 }
  0x2a   :  { %232 = vmatpush3.msra.mxu0 %v71_v33 }
  0x2b   :  { %233 = vmatprep.subr.mxu0 %v293_v0 }
  0x2c   :  { %234 = vmatpush3.msra.mxu0 %v70_v36 }
  0x2d   :  { %235 = vmatprep.subr.mxu0 %v293_v0 }
  0x2e   :  { %236 = vmatpush3.msra.mxu0 %v69_v37 }
  0x2f   :  { %238 = vmatmul.mubr.f32.vlgmr.msra.gmra.mxu0 %v68_v38 }
  0xef   :  { %v158_v40 = vpop.f32.mrf.mxu0 }
  0xf0   :  { %v159_v41 = vadd.f32 %v187_v39, %v158_v40 }
  0xf1   :  { %v239_v42 = vpop.f32.mrf.mxu0 }
  0xf2   :  { %162 = vst [vmem:[#allocation5] sm:$0xff] %v159_v41 }
  0xf3   :  { %277 = shalt.err (!%p274_p9)
}
  0xf4   :  { %172 = dma.vmem_to_hbm [thread:$0]  %s170_s9, 128, %s374_s4, [#allocation4]  }
  0xf5   :  { %288 = dma.done.wait [#allocation4], 128  }
  0xf6   :  { %289 = vsyncadd [#allocation4], 4294967168 }
  0xf7   :  { %176 = vsyncpa [#allocation3], 1 }
  0xf8   :  { %177 = vsyncpa [#allocation4], 1 }

</bundles_post_ra>
